<compile_context>
chip_gen: v6e
topology: v6e:2x2x1
jax: 0.10.0
libtpu: 0.0.40
codegen_flags: <defaults>
</compile_context>

<pallas_src>
import functools

import jax
import jax.numpy as jnp
from jax.experimental import pallas as pl
from jax.experimental.pallas import tpu as pltpu


def _highpass_kernel(xp_ref, o_ref, *, inv_w, H, W):
    # xp_ref: (tile, H+2, W+2) zero-padded input planes
    # o_ref:  (tile, H, W)     output planes
    xp = xp_ref[...]
    center = xp[:, 1:1 + H, 1:1 + W]
    neigh = jnp.zeros_like(center)
    for di in range(3):
        for dj in range(3):
            if di == 1 and dj == 1:
                continue
            neigh = neigh + xp[:, di:di + H, dj:dj + W]
    out = (8.0 * center - neigh) * inv_w
    o_ref[...] = out.astype(o_ref.dtype)


@functools.partial(jax.jit, static_argnames=("w_hpf", "tile_bc"))
def highpass_forward(x, w_hpf, tile_bc=8):
    """Pallas implementation of HighPass.forward.

    x: (B, C, H, W) float array.  Returns (B, C, H, W) float32.
    """
    B, C, H, W = x.shape
    n = B * C
    xf = x.reshape(n, H, W).astype(jnp.float32)
    # Zero-pad the spatial dims (conv2d padding=1).
    xp = jnp.pad(xf, ((0, 0), (1, 1), (1, 1)))

    # Pick the tile over the plane (B*C) axis: large enough to amortize
    # per-step overhead, but keep >= 2 grid steps when possible so the
    # "parallel" axis can shard across both v7x TensorCores.
    tile = max(1, min(tile_bc, n))
    if n > 1 and pl.cdiv(n, tile) < 2:
        tile = pl.cdiv(n, 2)
    n_pad = pl.cdiv(n, tile) * tile
    if n_pad != n:
        xp = jnp.pad(xp, ((0, n_pad - n), (0, 0), (0, 0)))

    kernel = functools.partial(
        _highpass_kernel, inv_w=1.0 / float(w_hpf), H=H, W=W)

    cost = pl.CostEstimate(
        flops=int(n_pad * H * W * 11),          # 8 adds + mul + sub + scale
        transcendentals=0,
        bytes_accessed=int(4 * (n_pad * (H + 2) * (W + 2) + n_pad * H * W)),
    )

    out = pl.pallas_call(
        kernel,
        out_shape=jax.ShapeDtypeStruct((n_pad, H, W), jnp.float32),
        grid_spec=pltpu.PrefetchScalarGridSpec(
            num_scalar_prefetch=0,
            grid=(n_pad // tile,),
            in_specs=[
                # Full spatial extent per block => last two dims equal the
                # array dims, so the (8,128) divisibility rule is satisfied.
                pl.BlockSpec((tile, H + 2, W + 2), lambda i: (i, 0, 0)),
            ],
            out_specs=pl.BlockSpec((tile, H, W), lambda i: (i, 0, 0)),
        ),
        compiler_params=pltpu.CompilerParams(
            dimension_semantics=("parallel",)),
        cost_estimate=cost,
    )(xp)

    return out[:n].reshape(B, C, H, W)


def reference_forward(x, w_hpf):
    """Pure-JAX depthwise conv reference matching F.conv2d(..., groups=C)."""
    B, C, H, W = x.shape
    filt = jnp.array([[-1., -1., -1.],
                      [-1., 8., -1.],
                      [-1., -1., -1.]], jnp.float32) / float(w_hpf)
    kernel = jnp.broadcast_to(filt, (C, 1, 3, 3))
    return jax.lax.conv_general_dilated(
        x.astype(jnp.float32), kernel,
        window_strides=(1, 1), padding=((1, 1), (1, 1)),
        dimension_numbers=("NCHW", "OIHW", "NCHW"),
        feature_group_count=C)


if __name__ == "__main__":
    key = jax.random.PRNGKey(0)

    # Small shapes consistent with the module: B=2, C=4, H=W=16.
    B, C, H, W = 2, 4, 16, 16
    w_hpf = 2.0
    x = jax.random.normal(key, (B, C, H, W), jnp.float32)

    out = highpass_forward(x, w_hpf)
    out = jax.block_until_ready(out)

    ref = reference_forward(x, w_hpf)
    assert out.shape == (B, C, H, W), out.shape
    assert jnp.allclose(out, ref, atol=1e-4, rtol=1e-4), "mismatch vs reference"

    print("KERNEL_OK")
</pallas_src>

<mosaic_0001>
module attributes {stable_mosaic.version = 11 : i64} {
  func.func @_highpass_kernel(%arg0: i32, %arg1: memref<4x18x18xf32, #tpu.memory_space<vmem>>, %arg2: memref<4x16x16xf32, #tpu.memory_space<vmem>>) attributes {dimension_semantics = [#tpu.dimension_semantics<parallel>], iteration_bounds = array<i64: 2>, scalar_prefetch = 0 : i64, scratch_operands = 0 : i64, tpu.core_type = #tpu.core_type<tc>, window_params = [{transform_indices = @transform_0, window_bounds = array<i64: 4, 18, 18>}, {transform_indices = @transform_1, window_bounds = array<i64: 4, 16, 16>}]} {
    %c0 = arith.constant 0 : index
    %c0_0 = arith.constant 0 : index
    %c0_1 = arith.constant 0 : index
    %0 = vector.load %arg1[%c0, %c0_0, %c0_1] : memref<4x18x18xf32, #tpu.memory_space<vmem>>, vector<4x18x18xf32>
    %1 = vector.extract_strided_slice %0 {offsets = [0, 1, 1], sizes = [4, 16, 16], strides = [1, 1, 1]} : vector<4x18x18xf32> to vector<4x16x16xf32>
    %cst = arith.constant 0.000000e+00 : f32
    %2 = vector.broadcast %cst : f32 to vector<4x16x16xf32>
    %3 = vector.extract_strided_slice %0 {offsets = [0, 0, 0], sizes = [4, 16, 16], strides = [1, 1, 1]} : vector<4x18x18xf32> to vector<4x16x16xf32>
    %4 = arith.addf %2, %3 : vector<4x16x16xf32>
    %5 = vector.extract_strided_slice %0 {offsets = [0, 0, 1], sizes = [4, 16, 16], strides = [1, 1, 1]} : vector<4x18x18xf32> to vector<4x16x16xf32>
    %6 = arith.addf %4, %5 : vector<4x16x16xf32>
    %7 = vector.extract_strided_slice %0 {offsets = [0, 0, 2], sizes = [4, 16, 16], strides = [1, 1, 1]} : vector<4x18x18xf32> to vector<4x16x16xf32>
    %8 = arith.addf %6, %7 : vector<4x16x16xf32>
    %9 = vector.extract_strided_slice %0 {offsets = [0, 1, 0], sizes = [4, 16, 16], strides = [1, 1, 1]} : vector<4x18x18xf32> to vector<4x16x16xf32>
    %10 = arith.addf %8, %9 : vector<4x16x16xf32>
    %11 = vector.extract_strided_slice %0 {offsets = [0, 1, 2], sizes = [4, 16, 16], strides = [1, 1, 1]} : vector<4x18x18xf32> to vector<4x16x16xf32>
    %12 = arith.addf %10, %11 : vector<4x16x16xf32>
    %13 = vector.extract_strided_slice %0 {offsets = [0, 2, 0], sizes = [4, 16, 16], strides = [1, 1, 1]} : vector<4x18x18xf32> to vector<4x16x16xf32>
    %14 = arith.addf %12, %13 : vector<4x16x16xf32>
    %15 = vector.extract_strided_slice %0 {offsets = [0, 2, 1], sizes = [4, 16, 16], strides = [1, 1, 1]} : vector<4x18x18xf32> to vector<4x16x16xf32>
    %16 = arith.addf %14, %15 : vector<4x16x16xf32>
    %17 = vector.extract_strided_slice %0 {offsets = [0, 2, 2], sizes = [4, 16, 16], strides = [1, 1, 1]} : vector<4x18x18xf32> to vector<4x16x16xf32>
    %18 = arith.addf %16, %17 : vector<4x16x16xf32>
    %cst_2 = arith.constant 8.000000e+00 : f32
    %19 = vector.broadcast %cst_2 : f32 to vector<4x16x16xf32>
    %20 = arith.mulf %19, %1 : vector<4x16x16xf32>
    %21 = arith.subf %20, %18 : vector<4x16x16xf32>
    %cst_3 = arith.constant 5.000000e-01 : f32
    %22 = vector.broadcast %cst_3 : f32 to vector<4x16x16xf32>
    %23 = arith.mulf %21, %22 : vector<4x16x16xf32>
    %c0_4 = arith.constant 0 : index
    %c0_5 = arith.constant 0 : index
    %c0_6 = arith.constant 0 : index
    %24 = vector.load %arg2[%c0_4, %c0_5, %c0_6] : memref<4x16x16xf32, #tpu.memory_space<vmem>>, vector<4x16x16xf32>
    tpu.vector_store %arg2[%c0_4, %c0_5, %c0_6], %23 {strides = array<i32>} : memref<4x16x16xf32, #tpu.memory_space<vmem>>, vector<4x16x16xf32>,
    return
  }
  func.func @transform_0(%arg0: i32) -> (i32, i32, i32) {
    %c0_i32 = arith.constant 0 : i32
    %c0_i32_0 = arith.constant 0 : i32
    %c0_i32_1 = arith.constant 0 : i32
    return %arg0, %c0_i32, %c0_i32_0 : i32, i32, i32
  }
  func.func @transform_1(%arg0: i32) -> (i32, i32, i32) {
    %c0_i32 = arith.constant 0 : i32
    %c0_i32_0 = arith.constant 0 : i32
    %c0_i32_1 = arith.constant 0 : i32
    return %arg0, %c0_i32, %c0_i32_0 : i32, i32, i32
  }
}

</mosaic_0001>

<bundles_post_ra>
// kernel: highpass_forward.1
= control target key start
LH: loop header
LB: loop body
LE: loop exit
PB: predicated region body
PF: predicated region fallthrough
CT: control target
= control target key end

     0   :  { %6 = vsyncpa [#allocation3], 0  ;;  %s1124_s0 = inlined_call_operand.vmem [shape: f32[8,18,18], index: 0, kind: input, shape index: {}]   ;;  %s1125_s1 = inlined_call_operand.hbm [shape: f32[8,16,16], index: 1, kind: output, shape index: {}]  }
   0x1   :  { %8 = vsyncpa [#allocation3 + $0x1], 0  ;;  %s758_s6 = smov 0   ;;  %s760_s7 = smov 0  }
   0x2   :  { %s762_s8 = smov 0   ;;  %s764_s9 = smov 0  }
   0x3 LB: > { %s779_s10 = sadd.s32 4294967295, %s740_s9   ;;  %s620_s11 = sadd.s32 4294967294, %s740_s9   ;;  %s740_s9 = sphi %s764_s9, %s1146_s9   ;;  %s736_s8 = sphi %s762_s8, %s1145_s8   ;;  %s732_s7 = sphi %s760_s7, %s1144_s7   ;;  %s728_s6 = sphi %s758_s6, %s1143_s6  }
   0x4   : > { %s783_s12 = sadd.s32 1, %s740_s9   ;;  %s47_s13 = sadd.s32 1, %s736_s8 }
   0x5   : > { %s44_s14 = ssub.s32 %s740_s9, %s783_s12  ;;  %p57_p0 = scmp.ne.s32.totalorder %s736_s8, %s732_s7 }
   0x6   : > { %p45_p1 = scmp.eq.s32.totalorder %s44_s14, 0  ;;  %p58_p2 = scmp.eq.s32.totalorder %s779_s10, 1 }
   0x7   : > { %p63_p3 = scmp.ne.s32.totalorder %s732_s7, %s728_s6  ;;  %p64_p4 = scmp.eq.s32.totalorder %s620_s11, 1 }
   0x8   : > { %s794_s15 = scalar_select %p45_p1, %s736_s8, %s47_s13  }
   0x9   : > { %p796_p5 = por %p58_p2, %p57_p0  ;;  %p800_p6 = por %p64_p4, %p63_p3 }
   0xa   : > { %p623_p7 = scmp.ge.s32.totalorder %s740_s9, 1  ;;  %p92_p8 = scmp.lt.s32.totalorder %s740_s9, 3 }
   0xc   : > { %p93_p9 = pnand %p623_p7, %p92_p8 }
   0xe   : > { %96 = sbr.rel (%p93_p9) target bundleno = 482 (0x1e2), region = 24 }
  0x13   : > { %s625_s18 = sshll.u32 %s779_s10, 2  ;;  %s742_s23 = smov 127   ;;  %vm217_vm0 = vcmask 1046528   ;;  %vm286_vm1 = vcmask 1045504   ;;  %vm407_vm2 = vcmask 1040384   ;;  %vm528_vm3 = vcmask 130049  }
  0x14   : > { %p114_p10 = scmp.lt.s32.totalorder %s625_s18, 7  ;;  %s743_s24 = smov 126   ;;  %vm532_vm4 = vcmask 122880   ;;  %vm530_vm5 = vcmask 130048  }
  0x15   : > { %s744_s25 = smov 1   ;;  %s110_s26 = sand.u32 1, %s732_s7  }
  0x16   : > { %s1148_s18 = smov (!%p114_p10, %s625_s18), 7  ;;  %s624_s27 = sshll.u32 %s110_s26, 6 }
  0x17   : > { %s635_s19 = smul.u32 24, %s1148_s18  ;;  %s112_s28 = scalar_lea.vmem [#allocation2], %s624_s27 }
  0x18   : > { %s634_s29 = sshll.u32 %s779_s10, 10  ;;  %s558_s30 = sshll.u32 %s112_s28, 4  ;;  %s1079_s30 = int_to_ptr.vmem [resolvable:$true] %s558_s30 }
  0x19   : > { %s810_s22 = scalar_lea.vmem %s1124_s0, %s635_s19  ;;  %s1077_s4 = scalar_lea.hbm %s1125_s1, %s634_s29 }
  0x1a   : > { %v813_v0 = vld [vmem:[%s810_s22 + $0x18] sm:$0xff]  ;;  %v816_v1 = vld [vmem:[%s810_s22] sm:$0xff]  ;;  %v826_v3 = vld [vmem:[%s810_s22 + $0x8] sm:$0xff]  ;;  %s1084_s5 = scalar_lea.sflag [#allocation3], %s110_s26  ;;  %s680_s10 = scalar_lea.vmem %s1079_s30, 1024 }
  0x1b   : > { %1133 = vst [vmem:[#allocation5_spill] sm:$0xff] %v816_v1  ;;  %153 = vrot.lane.b32.xlu1 %v813_v0, %s742_s23  ;;  %149 = vrot.lane.b32.xlu0 %v816_v1, %s742_s23  ;;  %v823_v2 = vld [vmem:[%s810_s22 + $0x20] sm:$0xff]  ;;  %v833_v4 = vld [vmem:[%s810_s22 + $0x38] sm:$0xff]  ;;  %v219_v9 = vrot.slane %v826_v3, 1  ;;  %v218_v11 = vrot.slane %v816_v1, 1  ;;  %v223_v17 = vrot.slane %v813_v0, 1  ;;  %p681_p11 = scmp.ne.s32.totalorder %s1079_s30, %s680_s10 }
  0x1c   : > { %v836_v5 = vld [vmem:[%s810_s22 + $0x30] sm:$0xff]  ;;  %v846_v7 = vld [vmem:[%s810_s22 + $0x48] sm:$0xff]  ;;  %v224_v13 = vrot.slane %v823_v2, 1  ;;  %v887_v18 = vld [vmem:[%s810_s22 + $0x40] sm:$0x3]  ;;  %v229_v19 = vrot.slane %v833_v4, 1 }
  0x1d   : > { %v843_v6 = vld [vmem:[%s810_s22 + $0x50] sm:$0xff]  ;;  %v871_v12 = vld [vmem:[%s810_s22 + $0x28] sm:$0x3]  ;;  %v882_v15 = vsel %vm217_vm0, %v218_v11, %v219_v9  ;;  %1136 = vst [vmem:[#allocation8_spill] sm:$0xff] %v887_v18  ;;  %v231_v22 = vrot.slane %v887_v18, 1  ;;  %v228_v23 = vrot.slane %v836_v5, 1  ;;  %p682_p12 = pnand %p681_p11, %p796_p5 }
  0x1e   : > { %v861_v8 = vld [vmem:[%s810_s22 + $0x10] sm:$0x3]  ;;  %1135 = vst [vmem:[#allocation7_spill] sm:$0xff] %v871_v12  ;;  %v226_v16 = vrot.slane %v871_v12, 1  ;;  %v898_v21 = vsel %vm217_vm0, %v223_v17, %v224_v13  ;;  %v903_v24 = vld [vmem:[%s810_s22 + $0x58] sm:$0x3] }
  0x1f   : > { %155 = vrot.lane.b32.xlu1 %v823_v2, %s742_s23  ;;  %151 = vrot.lane.b32.xlu0 %v826_v3, %s742_s23  ;;  %1134 = vst [vmem:[#allocation6_spill] sm:$0xff] %v861_v8  ;;  %v221_v10 = vrot.slane %v861_v8, 1  ;;  %1137 = vst [vmem:[#allocation9_spill] sm:$0xff] %v903_v24  ;;  %v234_v25 = vrot.slane %v843_v6, 1  ;;  %v911_v26 = vsel %vm217_vm0, %v229_v19, %v231_v22  ;;  %v236_v28 = vrot.slane %v903_v24, 1  ;;  %p683_p13 = pneg %p682_p12  ;;  %s745_s11 = smov [#allocation2]  }
  0x20   : > { %v895_v20 = vsel %vm217_vm0, %v224_v13, %v226_v16  ;;  %v914_v27 = vsel %vm217_vm0, %v228_v23, %v229_v19  ;;  %v233_v29 = vrot.slane %v846_v7, 1  ;;  %v288_v30 = vrot.slane %v826_v3, 2  ;;  %s684_s13 = sshll.u32 %s745_s11, 4  ;;  %s685_s13 = int_to_ptr.vmem [resolvable:$false] %s684_s13 }
  0x21   : > { %v879_v14 = vsel %vm217_vm0, %v219_v9, %v221_v10  ;;  %v287_v31 = vrot.slane %v816_v1, 2  ;;  %v925_v32 = vsel %vm217_vm0, %v234_v25, %v236_v28  ;;  %v290_v34 = vrot.slane %v861_v8, 2  ;;  %s686_s14 = scalar_lea.vmem %s685_s13, 2048  ;;  %p687_p0 = scmp.lt.s32.totalorder %s1079_s30, %s685_s13 }
  0x22   : > { %v928_v33 = vsel %vm217_vm0, %v233_v29, %v234_v25  ;;  %v293_v37 = vrot.slane %v823_v2, 2  ;;  %v295_v38 = vrot.slane %v871_v12, 2  ;;  %v292_v39 = vrot.slane %v813_v0, 2  ;;  %p688_p1 = scmp.lt.s32.totalorder %s686_s14, %s680_s10 }
  0x23   : > { %159 = vrot.lane.b32.xlu1 %v833_v4, %s742_s23  ;;  %157 = vrot.lane.b32.xlu0 %v836_v5, %s742_s23  ;;  %v936_v35 = vsel %vm286_vm1, %v287_v31, %v288_v30  ;;  %v939_v36 = vsel %vm286_vm1, %v288_v30, %v290_v34  ;;  %v298_v40 = vrot.slane %v833_v4, 2  ;;  %v300_v43 = vrot.slane %v887_v18, 2 }
  0x24   : > { %v950_v41 = vsel %vm286_vm1, %v293_v37, %v295_v38  ;;  %v953_v42 = vsel %vm286_vm1, %v292_v39, %v293_v37  ;;  %v297_v44 = vrot.slane %v836_v5, 2  ;;  %v303_v45 = vrot.slane %v843_v6, 2  ;;  %p689_p2 = por %p688_p1, %p687_p0 }
  0x25   : > { %v963_v46 = vsel %vm286_vm1, %v298_v40, %v300_v43  ;;  %v305_v48 = vrot.slane %v903_v24, 2  ;;  %v302_v49 = vrot.slane %v846_v7, 2 }
  0x26   : > { %v966_v47 = vsel %vm286_vm1, %v297_v44, %v298_v40  ;;  %p690_p3 = pnand %p689_p2, %p683_p13 }
  0x27   : > { %163 = vrot.lane.b32.xlu1 %v843_v6, %s742_s23  ;;  %161 = vrot.lane.b32.xlu0 %v846_v7, %s742_s23  ;;  %v975_v50 = vsel %vm286_vm1, %v303_v45, %v305_v48  ;;  %v978_v51 = vsel %vm286_vm1, %v302_v49, %v303_v45 }
  0x2b   : > { %183 = vrot.lane.b32.xlu1 %v826_v3, %s743_s24  ;;  %181 = vrot.lane.b32.xlu0 %v816_v1, %s743_s24 }
  0x2f   : > { %187 = vrot.lane.b32.xlu1 %v823_v2, %s743_s24  ;;  %185 = vrot.lane.b32.xlu0 %v813_v0, %s743_s24 }
  0x33   : > { %191 = vrot.lane.b32.xlu1 %v833_v4, %s743_s24  ;;  %189 = vrot.lane.b32.xlu0 %v836_v5, %s743_s24 }
  0x37   : > { %195 = vrot.lane.b32.xlu1 %v843_v6, %s743_s24  ;;  %193 = vrot.lane.b32.xlu0 %v846_v7, %s743_s24 }
  0x3b   : > { %256 = vrot.lane.b32.xlu1 %v879_v14, %s743_s24  ;;  %254 = vrot.lane.b32.xlu0 %v882_v15, %s743_s24 }
  0x3f   : > { %260 = vrot.lane.b32.xlu1 %v895_v20, %s743_s24  ;;  %258 = vrot.lane.b32.xlu0 %v898_v21, %s743_s24 }
  0x43   : > { %264 = vrot.lane.b32.xlu1 %v911_v26, %s743_s24  ;;  %262 = vrot.lane.b32.xlu0 %v914_v27, %s743_s24 }
  0x47   : > { %268 = vrot.lane.b32.xlu1 %v925_v32, %s743_s24  ;;  %266 = vrot.lane.b32.xlu0 %v928_v33, %s743_s24 }
  0x4b   : > { %325 = vrot.lane.b32.xlu1 %v939_v36, %s742_s23  ;;  %323 = vrot.lane.b32.xlu0 %v936_v35, %s742_s23 }
  0x4f   : > { %329 = vrot.lane.b32.xlu1 %v950_v41, %s742_s23  ;;  %327 = vrot.lane.b32.xlu0 %v953_v42, %s742_s23 }
  0x53   : > { %333 = vrot.lane.b32.xlu1 %v963_v46, %s742_s23  ;;  %331 = vrot.lane.b32.xlu0 %v966_v47, %s742_s23 }
  0x57   : > { %337 = vrot.lane.b32.xlu1 %v975_v50, %s742_s23  ;;  %335 = vrot.lane.b32.xlu0 %v978_v51, %s742_s23 }
  0x5b   : > { %357 = vrot.lane.b32.xlu1 %v939_v36, %s743_s24  ;;  %355 = vrot.lane.b32.xlu0 %v936_v35, %s743_s24 }
  0x5f   : > { %361 = vrot.lane.b32.xlu1 %v950_v41, %s743_s24  ;;  %359 = vrot.lane.b32.xlu0 %v953_v42, %s743_s24 }
  0x63   : > { %365 = vrot.lane.b32.xlu1 %v963_v46, %s743_s24  ;;  %363 = vrot.lane.b32.xlu0 %v966_v47, %s743_s24 }
  0x67   : > { %369 = vrot.lane.b32.xlu1 %v975_v50, %s743_s24  ;;  %367 = vrot.lane.b32.xlu0 %v978_v51, %s743_s24 }
  0x8d   : > { %v154_v52 = vpop.permute.xlu1 %153  ;;  %v150_v53 = vpop.permute.xlu0 %149 }
  0x8e   : > { %v173_v34 = vadd.f32 %v150_v53, %v816_v1  ;;  %v175_v43 = vadd.f32 %v154_v52, %v813_v0 }
  0x91   : > { %v156_v54 = vpop.permute.xlu1 %155  ;;  %v152_v55 = vpop.permute.xlu0 %151 }
  0x92   : > { %v174_v37 = vadd.f32 %v152_v55, %v826_v3  ;;  %v176_v45 = vadd.f32 %v156_v54, %v823_v2 }
  0x95   : > { %v160_v56 = vpop.permute.xlu1 %159  ;;  %v158_v57 = vpop.permute.xlu0 %157 }
  0x96   : > { %v177_v12 = vadd.f32 %v158_v57, %v836_v5  ;;  %v178_v55 = vadd.f32 %v160_v56, %v833_v4 }
  0x99   : > { %v164_v58 = vpop.permute.xlu1 %163  ;;  %v162_v59 = vpop.permute.xlu0 %161 }
  0x9d   : > { %v184_v60 = vpop.permute.xlu1 %183  ;;  %v182_v61 = vpop.permute.xlu0 %181 }
  0x9e   : > { %v205_v38 = vadd.f32 %v182_v61, %v173_v34  ;;  %v206_v44 = vadd.f32 %v184_v60, %v174_v37  ;;  %v179_v60 = vadd.f32 %v162_v59, %v846_v7 }
  0xa0   : > { %v246_v49 = vadd.f32 %v882_v15, %v205_v38  ;;  %v247_v53 = vadd.f32 %v879_v14, %v206_v44 }
  0xa1   : > { %v188_v62 = vpop.permute.xlu1 %187  ;;  %v186_v63 = vpop.permute.xlu0 %185 }
  0xa2   : > { %v207_v48 = vadd.f32 %v186_v63, %v175_v43  ;;  %v208_v8 = vadd.f32 %v188_v62, %v176_v45 }
  0xa4   : > { %v248_v52 = vadd.f32 %v898_v21, %v207_v48  ;;  %v249_v15 = vadd.f32 %v895_v20, %v208_v8 }
  0xa5   : > { %v192_v9 = vpop.permute.xlu1 %191  ;;  %v190_v10 = vpop.permute.xlu0 %189 }
  0xa6   : > { %v209_v61 = vadd.f32 %v190_v10, %v177_v12  ;;  %v210_v54 = vadd.f32 %v192_v9, %v178_v55  ;;  %v180_v10 = vadd.f32 %v164_v58, %v843_v6 }
  0xa8   : > { %v250_v14 = vadd.f32 %v914_v27, %v209_v61  ;;  %v251_v21 = vadd.f32 %v911_v26, %v210_v54 }
  0xa9   : > { %v196_v11 = vpop.permute.xlu1 %195  ;;  %v194_v13 = vpop.permute.xlu0 %193 }
  0xaa   : > { %v211_v62 = vadd.f32 %v194_v13, %v179_v60 }
  0xad   : > { %v257_v16 = vpop.permute.xlu1 %256  ;;  %v255_v17 = vpop.permute.xlu0 %254 }
  0xae   : > { %v278_v1 = vadd.f32 %v255_v17, %v246_v49  ;;  %v279_v34 = vadd.f32 %v257_v16, %v247_v53 }
  0xb0   : > { %v315_v57 = vadd.f32 %v936_v35, %v278_v1  ;;  %v316_v56 = vadd.f32 %v939_v36, %v279_v34  ;;  %v252_v35 = vadd.f32 %v928_v33, %v211_v62 }
  0xb1   : > { %v261_v19 = vpop.permute.xlu1 %260  ;;  %v259_v22 = vpop.permute.xlu0 %258 }
  0xb2   : > { %v280_v38 = vadd.f32 %v259_v22, %v248_v52  ;;  %v281_v43 = vadd.f32 %v261_v19, %v249_v15  ;;  %v212_v22 = vadd.f32 %v196_v11, %v180_v10 }
  0xb4   : > { %v317_v8 = vadd.f32 %v953_v42, %v280_v38  ;;  %v318_v27 = vadd.f32 %v950_v41, %v281_v43  ;;  %v253_v42 = vadd.f32 %v925_v32, %v212_v22 }
  0xb5   : > { %v265_v23 = vpop.permute.xlu1 %264  ;;  %v263_v25 = vpop.permute.xlu0 %262 }
  0xb6   : > { %v282_v16 = vadd.f32 %v263_v25, %v250_v14  ;;  %v283_v1 = vadd.f32 %v265_v23, %v251_v21  ;;  %v390_v14 = vmul.f32 8.0, %v813_v0  ;;  %v396_v0 = vmul.f32 8.0, %v846_v7 }
  0xb8   : > { %v319_v45 = vadd.f32 %v966_v47, %v282_v16  ;;  %v320_v11 = vadd.f32 %v963_v46, %v283_v1 }
  0xb9   : > { %v1000_v28 = vpop.permute.xlu1 %268  ;;  %v267_v29 = vpop.permute.xlu0 %266 }
  0xba   : > { %v284_v44 = vadd.f32 %v267_v29, %v252_v35 }
  0xbd   : > { %v326_v30 = vpop.permute.xlu1 %325  ;;  %v324_v31 = vpop.permute.xlu0 %323 }
  0xbe   : > { %v347_v12 = vadd.f32 %v324_v31, %v315_v57  ;;  %v348_v17 = vadd.f32 %v326_v30, %v316_v56  ;;  %v1139_v56 = vld [vmem:[#allocation6_spill] sm:$0xff] }
  0xc1   : > { %v330_v39 = vpop.permute.xlu1 %329  ;;  %v328_v40 = vpop.permute.xlu0 %327 }
  0xc2   : > { %v349_v13 = vadd.f32 %v328_v40, %v317_v8  ;;  %v350_v26 = vadd.f32 %v330_v39, %v318_v27  ;;  %v285_v40 = vadd.f32 %v1000_v28, %v253_v42  ;;  %v321_v39 = vadd.f32 %v978_v51, %v284_v44 }
  0xc3   : > { %v391_v42 = vmul.f32 8.0, %v823_v2 }
  0xc5   : > { %v334_v24 = vpop.permute.xlu1 %333  ;;  %v332_v18 = vpop.permute.xlu0 %331 }
  0xc6   : > { %v351_v33 = vadd.f32 %v332_v18, %v319_v45  ;;  %v352_v29 = vadd.f32 %v334_v24, %v320_v11  ;;  %v322_v18 = vadd.f32 %v975_v50, %v285_v40  ;;  %v388_v11 = vmul.f32 8.0, %v826_v3 }
  0xc9   : > { %v338_v63 = vpop.permute.xlu1 %337  ;;  %v336_v37 = vpop.permute.xlu0 %335 }
  0xca   : > { %v353_v53 = vadd.f32 %v336_v37, %v321_v39  ;;  %v354_v24 = vadd.f32 %v338_v63, %v322_v18  ;;  %v1138_v63 = vld [vmem:[#allocation5_spill] sm:$0xff] }
  0xcb   : > { %v387_v57 = vmul.f32 8.0, %v1138_v63 }
  0xcd   : > { %v358_v59 = vpop.permute.xlu1 %357  ;;  %v356_v9 = vpop.permute.xlu0 %355 }
  0xce   : > { %v379_v20 = vadd.f32 %v356_v9, %v347_v12  ;;  %v380_v36 = vadd.f32 %v358_v59, %v348_v17  ;;  %v389_v12 = vmul.f32 8.0, %v1139_v56  ;;  %v1140_v17 = vld [vmem:[#allocation7_spill] sm:$0xff] }
  0xcf   : > { %v392_v8 = vmul.f32 8.0, %v1140_v17 }
  0xd0   : > { %v408_v19 = vrot.slane %v379_v20, 7  ;;  %v409_v23 = vrot.slane %v380_v36, 7  ;;  %v393_v20 = vmul.f32 8.0, %v836_v5 }
  0xd1   : > { %v362_v31 = vpop.permute.xlu1 %361  ;;  %v360_v58 = vpop.permute.xlu0 %359 }
  0xd2   : > { %v381_v25 = vadd.f32 %v360_v58, %v349_v13  ;;  %420 = vrot.lane.b32.xlu0 %v408_v19, %s744_s25  ;;  %v382_v41 = vadd.f32 %v362_v31, %v350_v26  ;;  %v410_v15 = vsel %vm407_vm2, %v408_v19, %v409_v23  ;;  %v1141_v19 = vld [vmem:[#allocation8_spill] sm:$0xff] }
  0xd3   : > { %v395_v31 = vmul.f32 8.0, %v1141_v19 }
  0xd4   : > { %v411_v30 = vrot.slane %v381_v25, 7  ;;  %v412_v32 = vrot.slane %v382_v41, 7 }
  0xd5   : > { %v366_v48 = vpop.permute.xlu1 %365  ;;  %v364_v49 = vpop.permute.xlu0 %363 }
  0xd6   : > { %v383_v47 = vadd.f32 %v364_v49, %v351_v33  ;;  %426 = vrot.lane.b32.xlu1 %v411_v30, %s744_s25  ;;  %424 = vrot.lane.b32.xlu0 %v409_v23, %s744_s25  ;;  %v384_v55 = vadd.f32 %v366_v48, %v352_v29  ;;  %v413_v37 = vsel %vm407_vm2, %v411_v30, %v412_v32  ;;  %v397_v48 = vmul.f32 8.0, %v843_v6 }
  0xd7   : > { %v394_v49 = vmul.f32 8.0, %v833_v4 }
  0xd8   : > { %v414_v46 = vrot.slane %v383_v47, 7  ;;  %v415_v51 = vrot.slane %v384_v55, 7 }
  0xd9   : > { %v368_v61 = vpop.permute.xlu0 %367  ;;  %v370_v34 = vpop.permute.xlu1 %369 }
  0xda   : > { %v385_v52 = vadd.f32 %v368_v61, %v353_v53  ;;  %430 = vrot.lane.b32.xlu1 %v412_v32, %s744_s25  ;;  %432 = vrot.lane.b32.xlu0 %v414_v46, %s744_s25  ;;  %v386_v60 = vadd.f32 %v370_v34, %v354_v24  ;;  %v416_v38 = vsel %vm407_vm2, %v414_v46, %v415_v51  ;;  %v1142_v32 = vld [vmem:[#allocation9_spill] sm:$0xff] }
  0xdb   : > { %v398_v55 = vmul.f32 8.0, %v1142_v32 }
  0xdc   : > { %v417_v28 = vrot.slane %v385_v52, 7  ;;  %v418_v54 = vrot.slane %v386_v60, 7 }
  0xde   : > { %438 = vrot.lane.b32.xlu1 %v417_v28, %s744_s25  ;;  %436 = vrot.lane.b32.xlu0 %v415_v51, %s744_s25  ;;  %v419_v50 = vsel %vm407_vm2, %v417_v28, %v418_v54 }
  0xe2   : > { %428 = vrot.lane.b32.xlu0 %v413_v37, %s744_s25  ;;  %422 = vrot.lane.b32.xlu1 %v410_v15, %s744_s25 }
  0xe6   : > { %440 = vrot.lane.b32.xlu0 %v419_v50, %s744_s25  ;;  %434 = vrot.lane.b32.xlu1 %v416_v38, %s744_s25 }
  0xea   : > { %442 = vrot.lane.b32.xlu1 %v418_v54, %s744_s25 }
 0x144   : > { %v421_v62 = vpop.permute.xlu0 %420 }
 0x145   : > { %v456_v43 = vsub.f32 %v387_v57, %v421_v62 }
 0x147   : > { %v468_v10 = vmul.f32 0.5, %v456_v43 }
 0x148   : > { %v427_v21 = vpop.permute.xlu1 %426  ;;  %v425_v59 = vpop.permute.xlu0 %424 }
 0x149   : > { %v459_v9 = vsub.f32 %v390_v14, %v427_v21  ;;  %v458_v16 = vsub.f32 %v389_v12, %v425_v59  ;;  %492 = vrot.lane.b32.xlu0 %v468_v10, %s742_s23 }
 0x14b   : > { %v471_v22 = vmul.f32 0.5, %v459_v9  ;;  %v470_v1 = vmul.f32 0.5, %v458_v16 }
 0x14c   : > { %v431_v35 = vpop.permute.xlu1 %430  ;;  %v433_v27 = vpop.permute.xlu0 %432 }
 0x14d   : > { %v461_v13 = vsub.f32 %v392_v8, %v431_v35  ;;  %v462_v36 = vsub.f32 %v393_v20, %v433_v27  ;;  %496 = vrot.lane.b32.xlu0 %v470_v1, %s742_s23  ;;  %498 = vrot.lane.b32.xlu1 %v471_v22, %s742_s23 }
 0x14f   : > { %v473_v58 = vmul.f32 0.5, %v461_v13  ;;  %v474_v44 = vmul.f32 0.5, %v462_v36 }
 0x150   : > { %v439_v26 = vpop.permute.xlu1 %438  ;;  %v437_v45 = vpop.permute.xlu0 %436 }
 0x151   : > { %v465_v25 = vsub.f32 %v396_v0, %v439_v26  ;;  %v464_v5 = vsub.f32 %v395_v31, %v437_v45  ;;  %504 = vrot.lane.b32.xlu0 %v474_v44, %s742_s23  ;;  %502 = vrot.lane.b32.xlu1 %v473_v58, %s742_s23 }
 0x153   : > { %v477_v33 = vmul.f32 0.5, %v465_v25  ;;  %v476_v23 = vmul.f32 0.5, %v464_v5 }
 0x154   : > { %v429_v41 = vpop.permute.xlu0 %428  ;;  %v423_v7 = vpop.permute.xlu1 %422 }
 0x155   : > { %v460_v30 = vsub.f32 %v391_v42, %v429_v41  ;;  %v457_v40 = vsub.f32 %v388_v11, %v423_v7  ;;  %508 = vrot.lane.b32.xlu0 %v476_v23, %s742_s23  ;;  %510 = vrot.lane.b32.xlu1 %v477_v33, %s742_s23 }
 0x157   : > { %v472_v29 = vmul.f32 0.5, %v460_v30  ;;  %v469_v39 = vmul.f32 0.5, %v457_v40 }
 0x158   : > { %v441_v2 = vpop.permute.xlu0 %440  ;;  %v435_v3 = vpop.permute.xlu1 %434 }
 0x159   : > { %v466_v47 = vsub.f32 %v397_v48, %v441_v2  ;;  %v463_v53 = vsub.f32 %v394_v49, %v435_v3  ;;  %500 = vrot.lane.b32.xlu0 %v472_v29, %s742_s23  ;;  %494 = vrot.lane.b32.xlu1 %v469_v39, %s742_s23 }
 0x15b   : > { %v478_v46 = vmul.f32 0.5, %v466_v47  ;;  %v475_v18 = vmul.f32 0.5, %v463_v53 }
 0x15c   : > { %v443_v61 = vpop.permute.xlu1 %442 }
 0x15d   : > { %v467_v6 = vsub.f32 %v398_v55, %v443_v61  ;;  %512 = vrot.lane.b32.xlu0 %v478_v46, %s742_s23  ;;  %506 = vrot.lane.b32.xlu1 %v475_v18, %s742_s23 }
 0x15f   : > { %v479_v4 = vmul.f32 0.5, %v467_v6 }
 0x161   : > { %514 = vrot.lane.b32.xlu1 %v479_v4, %s742_s23 }
 0x1bb   : > { %v493_v34 = vpop.permute.xlu0 %492 }
 0x1bc   : > { %529 = vst.msk [vmem:[%s112_s28 - $0x1] sm:$0xfe] %vm528_vm3, %v493_v34 }
 0x1bf   : > { %v497_v52 = vpop.permute.xlu0 %496  ;;  %v499_v24 = vpop.permute.xlu1 %498 }
 0x1c0   : > { %533 = vst.msk [vmem:[%s112_s28 + $0xf] sm:$0x1] %vm532_vm4, %v497_v52 }
 0x1c1   : > { %534 = vst.msk [vmem:[%s112_s28 + $0xf] sm:$0xfe] %vm528_vm3, %v499_v24 }
 0x1c3   : > { %v505_v51 = vpop.permute.xlu0 %504  ;;  %v503_v28 = vpop.permute.xlu1 %502 }
 0x1c4   : > { %537 = vst.msk [vmem:[%s112_s28 + $0x1f] sm:$0xfe] %vm528_vm3, %v505_v51 }
 0x1c5   : > { %536 = vst.msk [vmem:[%s112_s28 + $0x1f] sm:$0x1] %vm532_vm4, %v503_v28 }
 0x1c7   : > { %v509_v60 = vpop.permute.xlu0 %508  ;;  %v511_v54 = vpop.permute.xlu1 %510 }
 0x1c8   : > { %539 = vst.msk [vmem:[%s112_s28 + $0x2f] sm:$0x1] %vm532_vm4, %v509_v60 }
 0x1c9   : > { %540 = vst.msk [vmem:[%s112_s28 + $0x2f] sm:$0xfe] %vm528_vm3, %v511_v54 }
 0x1cb   : > { %v501_v37 = vpop.permute.xlu0 %500  ;;  %v495_v15 = vpop.permute.xlu1 %494 }
 0x1cc   : > { %535 = vst.msk [vmem:[%s112_s28 + $0x17] sm:$0xff] %vm530_vm5, %v501_v37  ;;  %531 = vst.msk [vmem:[%s112_s28 + $0x7] sm:$0xff] %vm530_vm5, %v495_v15 }
 0x1cf   : > { %v513_v50 = vpop.permute.xlu0 %512  ;;  %v507_v38 = vpop.permute.xlu1 %506 }
 0x1d0   : > { %541 = vst.msk [vmem:[%s112_s28 + $0x37] sm:$0xff] %vm530_vm5, %v513_v50  ;;  %538 = vst.msk [vmem:[%s112_s28 + $0x27] sm:$0xff] %vm530_vm5, %v507_v38 }
 0x1d3   : > { %v515_v63 = vpop.permute.xlu1 %514 }
 0x1d4   : > { %542 = vst.msk [vmem:[%s112_s28 + $0x3f] sm:$0x1] %vm532_vm4, %v515_v63 }
 0x1d5   : > { %693 = shalt.err (!%p690_p3)
}
 0x1d6   : > { %s694_s18 = scalar_lea.hbm %s1077_s4, 1024  ;;  %s698_s21 = scalar_lea.hbm %s1125_s1, 2048 }
 0x1d7   : > { %p695_p4 = scmp.ne.s32.totalorder %s1077_s4, %s694_s18  ;;  %p699_p9 = scmp.lt.s32.totalorder %s1077_s4, %s1125_s1 }
 0x1d8   : > { %p700_p10 = scmp.lt.s32.totalorder %s698_s21, %s694_s18 }
 0x1d9   : > { %p696_p7 = pnand %p695_p4, %p796_p5 }
 0x1da   : > { %p701_p11 = por %p700_p10, %p699_p9 }
 0x1db   : > { %p697_p8 = pneg %p696_p7 }
 0x1dd   : > { %p702_p12 = pnand %p701_p11, %p697_p8 }
 0x1df   : > { %705 = shalt.err (!%p702_p12)
}
 0x1e0   : > { %s746_s24 = smov 128   ;;  %s747_s25 = smov 8  }
 0x1e1   : > { %636 = dma.vmem_to_hbm [thread:$0]  (%p796_p5), %s1079_s30, 1024, %s1077_s4, %s1084_s5, %s746_s24, %s746_s24, %s747_s25  }
 0x1e2 PF: > { %p642_p13 = scmp.ge.s32.totalorder %s740_s9, 2  ;;  %s573_s26 = sand.u32 1, %s728_s6  }
 0x1e3   : > { %s574_s27 = scalar_lea.sflag [#allocation3], %s573_s26 }
 0x1e4   : > { %p639_p0 = pnand %p642_p13, %p800_p6 }
 0x1e6   : > { %p640_p1 = pneg %p639_p0 }
 0x1e8   : > { %723 = dma.done.wait (%p640_p1), %s574_s27, 1024  }
 0x1e9   : > { %725 = vsyncadd (%p640_p1), %s574_s27, 4294966272  ;;  %p11_p2 = scmp.ge.s32.totalorder %s783_s12, 4   ;;  %s1143_s6 = smov %s732_s7 }
 0x1ea   : > { %s1144_s7 = smov %s736_s8  ;;  %s1145_s8 = smov %s794_s15 }
 0x1eb   : > { %s1146_s9 = smov %s783_s12  ;;  %13 = sbr.rel (!%p11_p2) target bundleno = 3 (0x3), region = 59 }
 0x1f0   :  { %579 = vsyncpa [#allocation3], 1 }
 0x1f1   :  { %581 = vsyncpa [#allocation3 + $0x1], 1 }

</bundles_post_ra>
